<compile_context>
chip_gen: v7x
topology: tpu7x:2x2x1
jax: 0.10.0
libtpu: 0.0.40
codegen_flags: <defaults>
</compile_context>

<pallas_src>
import jax
import jax.numpy as jnp
import numpy as np
from jax import lax
from jax.experimental import pallas as pl
from jax.experimental.pallas import tpu as pltpu


# ---------------------------------------------------------------------------
# Glue: bounding box from skeletons (the PyTorch helper is not provided).
# TODO(synk): `get_min_max_from_skeletons` is external to the module; this is
#             a faithful re-implementation of its usual semantics (clamped
#             floor/ceil bbox of the joints), not a byte-exact port.
# ---------------------------------------------------------------------------
def get_min_max_from_skeletons(skls, H, W):
    # skls: (B, J, 2) with (x, y) pixel coordinates
    xs = skls[..., 0]
    ys = skls[..., 1]
    y_mins = jnp.clip(jnp.floor(jnp.min(ys, axis=1)), 0, H).astype(jnp.int32)
    y_maxs = jnp.clip(jnp.ceil(jnp.max(ys, axis=1)), 0, H).astype(jnp.int32)
    x_mins = jnp.clip(jnp.floor(jnp.min(xs, axis=1)), 0, W).astype(jnp.int32)
    x_maxs = jnp.clip(jnp.ceil(jnp.max(xs, axis=1)), 0, W).astype(jnp.int32)
    return y_mins, y_maxs, x_mins, x_maxs


# ---------------------------------------------------------------------------
# Tiling choices (trace-time, Python only).
# ---------------------------------------------------------------------------
def _round_up(x, m):
    return -(-x // m) * m


def _sublane_multiple(*dtypes):
    m = 8
    for dt in dtypes:
        m = max(m, 32 // jnp.dtype(dt).itemsize)   # f32:8, bf16:16, int8:32
    return m


def _choose_tiles(B, H, W, m_dtype, g_dtype):
    m_it = jnp.dtype(m_dtype).itemsize
    g_it = jnp.dtype(g_dtype).itemsize
    sub = _sublane_multiple(m_dtype, g_dtype)

    # Batch grouping: every grid step should move >= ~1 MiB (per-step pipeline
    # overhead ~0.35 us), but keep the parallel batch-group axis at >= 2 steps
    # so v7x can shard it across its two TensorCores.
    per_img = H * W * (m_it + g_it)
    tb_target = max(1, (1 << 20) // max(per_img, 1))
    tb_cap = max(1, min(tb_target, B // 2)) if B >= 2 else 1
    TB = 1
    for d in range(min(B, tb_cap), 0, -1):
        if B % d == 0:
            TB = d
            break

    # Row tile: ~16 MiB of double-buffered input blocks (measured HBM-roofline
    # sweet spot), capped at 1024 rows and rounded to the sublane quantum.
    # H is padded up to a multiple of TH in the wrapper, so there is never a
    # full-height fallback block that could exceed v7x's 64 MiB/TC VMEM.
    budget = 16 << 20
    row_bytes = 2 * TB * W * (m_it + g_it)            # x2: double buffering
    th_cap = max(sub, (budget // max(row_bytes, 1)) // sub * sub)
    TH = min(th_cap, 1024, _round_up(H, sub))
    TH = max(sub, (TH // sub) * sub)
    H_pad = _round_up(H, TH)
    return TB, TH, H_pad


# ---------------------------------------------------------------------------
# Pallas kernel factory: per-(batch-group, row-tile) masked BCE partials.
# Output accumulator, resident across the inner row-tile axis:
#   out[b, 0] = (8, W) partial of sum_{gt>0} softplus(-x)
#   out[b, 1] = (8, W) partial of count(gt>0)
#   out[b, 2] = (8, W) partial of sum_{outside bbox} softplus(x)
# ---------------------------------------------------------------------------
def _make_kernel(TB, TH, W):
    def fold(a):
        # (TH, W) -> (8, W) with VPU adds only (sublane-split reshape is a
        # layout no-op); the single XLU cross-lane reduce happens once, in the
        # JAX wrapper.
        return a.reshape(TH // 8, 8, W).sum(axis=0)

    def kernel(bbox_ref, masks_ref, gt_ref, out_ref):
        g = pl.program_id(0)        # batch group ("parallel")
        t = pl.program_id(1)        # row tile (innermost, "arbitrary")

        @pl.when(t == 0)
        def _init():
            out_ref[...] = jnp.zeros_like(out_ref)

        row_base = t * TH
        rows = lax.broadcasted_iota(jnp.int32, (TH, 1), 0)   # local row ids
        cols = lax.broadcasted_iota(jnp.int32, (1, W), 1)

        def step(tb, carry):
            b = g * TB + tb
            x = masks_ref[tb].astype(jnp.float32)   # (TH, W) logits
            gt = gt_ref[tb]                         # native dtype

            # numerically stable BCE-with-logits, shared sub-expressions:
            #   target=0 -> softplus( x) = relu(x) + log1p(exp(-|x|))
            #   target=1 -> softplus(-x) = softplus(x) - x
            relu = jnp.maximum(x, 0.0)
            l1p = jnp.log1p(jnp.exp(-jnp.abs(x)))
            bce_neg = relu + l1p
            bce_pos = bce_neg - x

            pos = gt > 0                             # reused compare

            # separable bbox mask; tile offset folded into the scalars
            y_min = bbox_ref[4 * b + 0] - row_base
            y_max = bbox_ref[4 * b + 1] - row_base
            x_min = bbox_ref[4 * b + 2]
            x_max = bbox_ref[4 * b + 3]
            row_in = (rows >= y_min) & (rows < y_max)     # (TH, 1)
            col_in = (cols >= x_min) & (cols < x_max)     # (1, W)
            inside = row_in & col_in                      # 1 AND / pixel

            out_ref[tb, 0] += fold(jnp.where(pos, bce_pos, 0.0))
            out_ref[tb, 1] += fold(pos.astype(jnp.float32))
            out_ref[tb, 2] += fold(jnp.where(inside, 0.0, bce_neg))
            return carry

        if TB <= 4:
            for tb in range(TB):                      # short: full unroll
                step(tb, 0)
        else:
            lax.fori_loop(0, TB, step, 0)             # bounded live ranges

    return kernel


def body_seg_val_loss(skls, masks, gt_masks, w_neg=1.0):
    B, H, W = masks.shape
    y_mins, y_maxs, x_mins, x_maxs = get_min_max_from_skeletons(skls, H, W)

    # flat 1-D (4*B,) int32 scalar-prefetch operand (avoids (B,4) SMEM padding)
    bboxes = jnp.stack([y_mins, y_maxs, x_mins, x_maxs],
                       axis=1).reshape(-1).astype(jnp.int32)

    TB, TH, H_pad = _choose_tiles(B, H, W, masks.dtype, gt_masks.dtype)

    if H_pad != H:
        # Padded logits use -1e4 so softplus(pad) == 0 exactly and padded gt
        # is 0, keeping both loss sums and the analytic neg count unchanged.
        pad = ((0, 0), (0, H_pad - H), (0, 0))
        masks = jnp.pad(masks, pad, constant_values=-1e4)
        gt_masks = jnp.pad(gt_masks, pad, constant_values=0)

    # NOTE: a block last dim equal to the full W is always legal; for best
    # lane/DMA utilisation the producer should supply W % 128 == 0.
    grid = (B // TB, H_pad // TH)
    kernel = _make_kernel(TB, TH, W)

    partials = pl.pallas_call(
        kernel,
        out_shape=jax.ShapeDtypeStruct((B, 3, 8, W), jnp.float32),
        grid_spec=pltpu.PrefetchScalarGridSpec(
            num_scalar_prefetch=1,
            grid=grid,
            in_specs=[
                # native-dtype inputs (no wrapper up-cast)
                pl.BlockSpec((TB, TH, W), lambda g, t, *_: (g, t, 0)),  # masks
                pl.BlockSpec((TB, TH, W), lambda g, t, *_: (g, t, 0)),  # gt
            ],
            out_specs=pl.BlockSpec((TB, 3, 8, W),
                                   lambda g, t, *_: (g, 0, 0, 0)),
        ),
        compiler_params=pltpu.CompilerParams(
            dimension_semantics=("parallel", "arbitrary"),
            vmem_limit_bytes=48 * 1024 * 1024,
        ),
    )(bboxes, masks, gt_masks)

    # single cross-lane reduce of the small partial planes, outside the kernel
    pos_sum = jnp.sum(partials[:, 0])
    # each count cell is a small exact integer in f32; sum exactly in int32
    pos_cnt = jnp.sum(partials[:, 1].astype(jnp.int32)).astype(jnp.float32)
    neg_sum = jnp.sum(partials[:, 2])

    # neg_cnt is analytic: H*W - bbox area per image, summed in int32
    area = (y_maxs - y_mins) * (x_maxs - x_mins)
    neg_cnt = jnp.sum(jnp.int32(H * W) - area).astype(jnp.float32)

    # BCEWithLogitsLoss(reduction='mean') over the boolean-selected elements.
    # (pos_cnt == 0 or a bbox covering the whole image yields NaN/Inf, matching
    #  the PyTorch reference.)
    return pos_sum / pos_cnt + w_neg * (neg_sum / neg_cnt)


# ---------------------------------------------------------------------------
# Pure-JAX reference (mirrors the PyTorch forward) for verification.
# ---------------------------------------------------------------------------
def body_seg_val_loss_ref(skls, masks, gt_masks, w_neg=1.0):
    B, H, W = masks.shape
    y_mins, y_maxs, x_mins, x_maxs = get_min_max_from_skeletons(skls, H, W)
    rows = jnp.arange(H)[None, :, None]
    cols = jnp.arange(W)[None, None, :]
    inside = ((rows >= y_mins[:, None, None]) & (rows < y_maxs[:, None, None]) &
              (cols >= x_mins[:, None, None]) & (cols < x_maxs[:, None, None]))
    pos = gt_masks > 0
    neg = jnp.logical_not(inside)
    x = masks.astype(jnp.float32)
    relu = jnp.maximum(x, 0.0)
    l1p = jnp.log1p(jnp.exp(-jnp.abs(x)))
    pos_elem = relu - x + l1p
    neg_elem = relu + l1p
    pos_loss = jnp.sum(jnp.where(pos, pos_elem, 0.0)) / jnp.sum(pos)
    neg_loss = jnp.sum(jnp.where(neg, neg_elem, 0.0)) / jnp.sum(neg)
    return pos_loss + w_neg * neg_loss


if __name__ == "__main__":
    key = jax.random.PRNGKey(0)

    def run_case(B, H, W, J, m_dtype, g_dtype, seed_key, tol):
        k1, k2, k3 = jax.random.split(seed_key, 3)
        # skeleton joints inside the image, (x, y) coords
        skls = jax.random.uniform(k1, (B, J, 2), jnp.float32,
                                  minval=2.0, maxval=float(min(H, W) - 3))
        masks = jax.random.normal(k2, (B, H, W), jnp.float32).astype(m_dtype)
        gt = (jax.random.uniform(k3, (B, H, W), jnp.float32) > 0.7
              ).astype(g_dtype)
        out = jax.block_until_ready(body_seg_val_loss(skls, masks, gt, 1.0))
        ref = jax.block_until_ready(body_seg_val_loss_ref(skls, masks, gt, 1.0))
        assert np.allclose(np.asarray(out), np.asarray(ref),
                           rtol=tol, atol=tol), (m_dtype, g_dtype, out, ref)

    keys = jax.random.split(key, 4)
    # basic f32 case, small shapes
    run_case(2, 16, 16, 5, jnp.float32, jnp.float32, keys[0], 1e-5)
    # native bf16 streaming (no wrapper up-cast)
    run_case(2, 16, 16, 5, jnp.bfloat16, jnp.bfloat16, keys[1], 1e-4)
    # TB > 4 -> in-kernel fori_loop over the batch group
    run_case(16, 16, 16, 5, jnp.float32, jnp.float32, keys[2], 1e-5)
    # odd H (row padding path) + int8 ground truth streamed natively
    run_case(6, 20, 24, 5, jnp.float32, jnp.int8, keys[3], 1e-5)

    print("KERNEL_OK")
</pallas_src>

<mosaic_0001>
module attributes {stable_mosaic.version = 11 : i64} {
  func.func @kernel(%arg0: i32, %arg1: i32, %arg2: memref<8xi32, #tpu.memory_space<smem>>, %arg3: memref<1x16x16xf32, #tpu.memory_space<vmem>>, %arg4: memref<1x16x16xf32, #tpu.memory_space<vmem>>, %arg5: memref<1x3x8x16xf32, #tpu.memory_space<vmem>>) attributes {dimension_semantics = [#tpu.dimension_semantics<parallel>, #tpu.dimension_semantics<arbitrary>], iteration_bounds = array<i64: 2, 1>, scalar_prefetch = 1 : i64, scratch_operands = 0 : i64, tpu.core_type = #tpu.core_type<tc>, window_params = [{transform_indices = @transform_0, window_bounds = array<i64: 1, 16, 16>}, {transform_indices = @transform_1, window_bounds = array<i64: 1, 16, 16>}, {transform_indices = @transform_2, window_bounds = array<i64: 1, 3, 8, 16>}]} {
    %c0_i32 = arith.constant 0 : i32
    %0 = arith.cmpi eq, %arg1, %c0_i32 : i32
    %1 = arith.extui %0 : i1 to i32
    %c0_i32_0 = arith.constant 0 : i32
    %2 = arith.cmpi ne, %1, %c0_i32_0 : i32
    scf.if %2 {
      %cst_41 = arith.constant 0.000000e+00 : f32
      %84 = vector.broadcast %cst_41 : f32 to vector<1x3x8x16xf32>
      %c0_42 = arith.constant 0 : index
      %c0_43 = arith.constant 0 : index
      %c0_44 = arith.constant 0 : index
      %c0_45 = arith.constant 0 : index
      %85 = vector.load %arg5[%c0_42, %c0_43, %c0_44, %c0_45] : memref<1x3x8x16xf32, #tpu.memory_space<vmem>>, vector<1x3x8x16xf32>
      tpu.vector_store %arg5[%c0_42, %c0_43, %c0_44, %c0_45], %84 {strides = array<i32>} : memref<1x3x8x16xf32, #tpu.memory_space<vmem>>, vector<1x3x8x16xf32>,
    } else {
    }
    %c16_i32 = arith.constant 16 : i32
    %3 = arith.muli %arg1, %c16_i32 : i32
    %4 = tpu.iota {dimensions = array<i32: 0>} : vector<16x1xi32>
    %5 = tpu.iota {dimensions = array<i32: 1>} : vector<1x16xi32>
    %c1_i32 = arith.constant 1 : i32
    %6 = arith.muli %arg0, %c1_i32 : i32
    %c0_i32_1 = arith.constant 0 : i32
    %7 = arith.addi %6, %c0_i32_1 : i32
    %c0 = arith.constant 0 : index
    %c0_2 = arith.constant 0 : index
    %c0_3 = arith.constant 0 : index
    %8 = vector.load %arg3[%c0, %c0_2, %c0_3] : memref<1x16x16xf32, #tpu.memory_space<vmem>>, vector<1x16x16xf32>
    %9 = vector.shape_cast %8 : vector<1x16x16xf32> to vector<16x16xf32>
    %c0_4 = arith.constant 0 : index
    %c0_5 = arith.constant 0 : index
    %c0_6 = arith.constant 0 : index
    %10 = vector.load %arg4[%c0_4, %c0_5, %c0_6] : memref<1x16x16xf32, #tpu.memory_space<vmem>>, vector<1x16x16xf32>
    %11 = vector.shape_cast %10 : vector<1x16x16xf32> to vector<16x16xf32>
    %cst = arith.constant 0.000000e+00 : f32
    %12 = vector.broadcast %cst : f32 to vector<16x16xf32>
    %13 = arith.maximumf %9, %12 : vector<16x16xf32>
    %14 = math.absf %9 : vector<16x16xf32>
    %cst_7 = arith.constant 0.000000e+00 : f32
    %15 = vector.broadcast %cst_7 : f32 to vector<16x16xf32>
    %16 = arith.subf %15, %14 : vector<16x16xf32>
    %17 = math.exp %16 : vector<16x16xf32>
    %18 = math.log1p %17 : vector<16x16xf32>
    %19 = arith.addf %13, %18 : vector<16x16xf32>
    %20 = arith.subf %19, %9 : vector<16x16xf32>
    %cst_8 = arith.constant 0.000000e+00 : f32
    %21 = vector.broadcast %cst_8 : f32 to vector<16x16xf32>
    %22 = arith.cmpf ogt, %11, %21 : vector<16x16xf32>
    %c4_i32 = arith.constant 4 : i32
    %23 = arith.muli %c4_i32, %7 : i32
    %c0_i32_9 = arith.constant 0 : i32
    %24 = arith.addi %23, %c0_i32_9 : i32
    %25 = arith.index_cast %24 : i32 to index
    %26 = memref.load %arg2[%25] : memref<8xi32, #tpu.memory_space<smem>>
    %27 = arith.subi %26, %3 : i32
    %c4_i32_10 = arith.constant 4 : i32
    %28 = arith.muli %c4_i32_10, %7 : i32
    %c1_i32_11 = arith.constant 1 : i32
    %29 = arith.addi %28, %c1_i32_11 : i32
    %30 = arith.index_cast %29 : i32 to index
    %31 = memref.load %arg2[%30] : memref<8xi32, #tpu.memory_space<smem>>
    %32 = arith.subi %31, %3 : i32
    %c4_i32_12 = arith.constant 4 : i32
    %33 = arith.muli %c4_i32_12, %7 : i32
    %c2_i32 = arith.constant 2 : i32
    %34 = arith.addi %33, %c2_i32 : i32
    %35 = arith.index_cast %34 : i32 to index
    %36 = memref.load %arg2[%35] : memref<8xi32, #tpu.memory_space<smem>>
    %c4_i32_13 = arith.constant 4 : i32
    %37 = arith.muli %c4_i32_13, %7 : i32
    %c3_i32 = arith.constant 3 : i32
    %38 = arith.addi %37, %c3_i32 : i32
    %39 = arith.index_cast %38 : i32 to index
    %40 = memref.load %arg2[%39] : memref<8xi32, #tpu.memory_space<smem>>
    %41 = vector.broadcast %27 : i32 to vector<16x1xi32>
    %42 = arith.cmpi sge, %4, %41 : vector<16x1xi32>
    %43 = vector.broadcast %32 : i32 to vector<16x1xi32>
    %44 = arith.cmpi slt, %4, %43 : vector<16x1xi32>
    %45 = arith.andi %42, %44 : vector<16x1xi1>
    %46 = vector.broadcast %36 : i32 to vector<1x16xi32>
    %47 = arith.cmpi sge, %5, %46 : vector<1x16xi32>
    %48 = vector.broadcast %40 : i32 to vector<1x16xi32>
    %49 = arith.cmpi slt, %5, %48 : vector<1x16xi32>
    %50 = arith.andi %47, %49 : vector<1x16xi1>
    %51 = vector.broadcast %45 : vector<16x1xi1> to vector<16x16xi1>
    %52 = vector.broadcast %50 : vector<1x16xi1> to vector<16x16xi1>
    %53 = arith.andi %51, %52 : vector<16x16xi1>
    %c0_14 = arith.constant 0 : index
    %c0_15 = arith.constant 0 : index
    %c0_16 = arith.constant 0 : index
    %c0_17 = arith.constant 0 : index
    %54 = vector.load %arg5[%c0_14, %c0_15, %c0_16, %c0_17] : memref<1x3x8x16xf32, #tpu.memory_space<vmem>>, vector<1x1x8x16xf32>
    %55 = vector.shape_cast %54 : vector<1x1x8x16xf32> to vector<8x16xf32>
    %cst_18 = arith.constant 0.000000e+00 : f32
    %56 = vector.broadcast %cst_18 : f32 to vector<16x16xf32>
    %57 = arith.select %22, %20, %56 : vector<16x16xi1>, vector<16x16xf32>
    %58 = vector.shape_cast %57 : vector<16x16xf32> to vector<2x8x16xf32>
    %cst_19 = arith.constant dense<0.000000e+00> : vector<8x16xf32>
    %59 = vector.multi_reduction <add>, %58, %cst_19 [0] : vector<2x8x16xf32> to vector<8x16xf32>
    %60 = arith.addf %55, %59 : vector<8x16xf32>
    %c0_20 = arith.constant 0 : index
    %c0_21 = arith.constant 0 : index
    %c0_22 = arith.constant 0 : index
    %c0_23 = arith.constant 0 : index
    %61 = vector.load %arg5[%c0_20, %c0_21, %c0_22, %c0_23] : memref<1x3x8x16xf32, #tpu.memory_space<vmem>>, vector<1x1x8x16xf32>
    %62 = vector.shape_cast %61 : vector<1x1x8x16xf32> to vector<8x16xf32>
    %63 = vector.shape_cast %60 : vector<8x16xf32> to vector<1x1x8x16xf32>
    tpu.vector_store %arg5[%c0_20, %c0_21, %c0_22, %c0_23], %63 {strides = array<i32>} : memref<1x3x8x16xf32, #tpu.memory_space<vmem>>, vector<1x1x8x16xf32>,
    %c0_24 = arith.constant 0 : index
    %c1 = arith.constant 1 : index
    %c0_25 = arith.constant 0 : index
    %c0_26 = arith.constant 0 : index
    %64 = vector.load %arg5[%c0_24, %c1, %c0_25, %c0_26] : memref<1x3x8x16xf32, #tpu.memory_space<vmem>>, vector<1x1x8x16xf32>
    %65 = vector.shape_cast %64 : vector<1x1x8x16xf32> to vector<8x16xf32>
    %66 = arith.extui %22 : vector<16x16xi1> to vector<16x16xi32>
    %67 = arith.sitofp %66 : vector<16x16xi32> to vector<16x16xf32>
    %68 = vector.shape_cast %67 : vector<16x16xf32> to vector<2x8x16xf32>
    %cst_27 = arith.constant dense<0.000000e+00> : vector<8x16xf32>
    %69 = vector.multi_reduction <add>, %68, %cst_27 [0] : vector<2x8x16xf32> to vector<8x16xf32>
    %70 = arith.addf %65, %69 : vector<8x16xf32>
    %c0_28 = arith.constant 0 : index
    %c1_29 = arith.constant 1 : index
    %c0_30 = arith.constant 0 : index
    %c0_31 = arith.constant 0 : index
    %71 = vector.load %arg5[%c0_28, %c1_29, %c0_30, %c0_31] : memref<1x3x8x16xf32, #tpu.memory_space<vmem>>, vector<1x1x8x16xf32>
    %72 = vector.shape_cast %71 : vector<1x1x8x16xf32> to vector<8x16xf32>
    %73 = vector.shape_cast %70 : vector<8x16xf32> to vector<1x1x8x16xf32>
    tpu.vector_store %arg5[%c0_28, %c1_29, %c0_30, %c0_31], %73 {strides = array<i32>} : memref<1x3x8x16xf32, #tpu.memory_space<vmem>>, vector<1x1x8x16xf32>,
    %c0_32 = arith.constant 0 : index
    %c2 = arith.constant 2 : index
    %c0_33 = arith.constant 0 : index
    %c0_34 = arith.constant 0 : index
    %74 = vector.load %arg5[%c0_32, %c2, %c0_33, %c0_34] : memref<1x3x8x16xf32, #tpu.memory_space<vmem>>, vector<1x1x8x16xf32>
    %75 = vector.shape_cast %74 : vector<1x1x8x16xf32> to vector<8x16xf32>
    %cst_35 = arith.constant 0.000000e+00 : f32
    %76 = vector.broadcast %cst_35 : f32 to vector<16x16xf32>
    %77 = arith.select %53, %76, %19 : vector<16x16xi1>, vector<16x16xf32>
    %78 = vector.shape_cast %77 : vector<16x16xf32> to vector<2x8x16xf32>
    %cst_36 = arith.constant dense<0.000000e+00> : vector<8x16xf32>
    %79 = vector.multi_reduction <add>, %78, %cst_36 [0] : vector<2x8x16xf32> to vector<8x16xf32>
    %80 = arith.addf %75, %79 : vector<8x16xf32>
    %c0_37 = arith.constant 0 : index
    %c2_38 = arith.constant 2 : index
    %c0_39 = arith.constant 0 : index
    %c0_40 = arith.constant 0 : index
    %81 = vector.load %arg5[%c0_37, %c2_38, %c0_39, %c0_40] : memref<1x3x8x16xf32, #tpu.memory_space<vmem>>, vector<1x1x8x16xf32>
    %82 = vector.shape_cast %81 : vector<1x1x8x16xf32> to vector<8x16xf32>
    %83 = vector.shape_cast %80 : vector<8x16xf32> to vector<1x1x8x16xf32>
    tpu.vector_store %arg5[%c0_37, %c2_38, %c0_39, %c0_40], %83 {strides = array<i32>} : memref<1x3x8x16xf32, #tpu.memory_space<vmem>>, vector<1x1x8x16xf32>,
    return
  }
  func.func @transform_0(%arg0: i32, %arg1: i32, %arg2: memref<8xi32, #tpu.memory_space<smem>>) -> (i32, i32, i32) {
    %c0_i32 = arith.constant 0 : i32
    %c0_i32_0 = arith.constant 0 : i32
    return %arg0, %arg1, %c0_i32 : i32, i32, i32
  }
  func.func @transform_1(%arg0: i32, %arg1: i32, %arg2: memref<8xi32, #tpu.memory_space<smem>>) -> (i32, i32, i32) {
    %c0_i32 = arith.constant 0 : i32
    %c0_i32_0 = arith.constant 0 : i32
    return %arg0, %arg1, %c0_i32 : i32, i32, i32
  }
  func.func @transform_2(%arg0: i32, %arg1: i32, %arg2: memref<8xi32, #tpu.memory_space<smem>>) -> (i32, i32, i32, i32) {
    %c0_i32 = arith.constant 0 : i32
    %c0_i32_0 = arith.constant 0 : i32
    %c0_i32_1 = arith.constant 0 : i32
    %c0_i32_2 = arith.constant 0 : i32
    return %arg0, %c0_i32, %c0_i32_0, %c0_i32_1 : i32, i32, i32, i32
  }
}

</mosaic_0001>

<bundles_post_ra>
// kernel: tpu_custom_call.1
= control target key start
LH: loop header
LB: loop body
LE: loop exit
PB: predicated region body
PF: predicated region fallthrough
CT: control target
= control target key end

     0   :  { %s1096_s0 = inlined_call_operand.hbm [shape: s32[8], index: 0, kind: input, shape index: {}]   ;;  %s1097_s1 = inlined_call_operand.hbm [shape: f32[2,16,16], index: 1, kind: input, shape index: {}]   ;;  %s1098_s2 = inlined_call_operand.hbm [shape: f32[2,16,16], index: 2, kind: input, shape index: {}]   ;;  %s1099_s3 = inlined_call_operand.hbm [shape: f32[2,3,8,16], index: 3, kind: output, shape index: {}]  }
   0x1   :  { %s573_s14 = scalar_lea.hbm %s1096_s0, 16 }
   0x2   :  { %p574_p0 = scmp.ne.s32.totalorder %s1096_s0, %s573_s14  ;;  %p577_p1 = scmp.lt.u32.totalorder %s573_s14, %s1096_s0 }
   0x4   :  { %p579_p2 = pnand %p577_p1, %p574_p0 }
   0x6   :  { %582 = shalt.err (!%p579_p2)  }
   0x7   :  { %s733_s19 = smov [#allocation3]  }
   0x8   :  { %9 = dma.hbm_to_smem %s1096_s0, 16, %s733_s19, [#allocation2] }
   0x9   :  { %695 = dma.done.wait [#allocation2], 16 }
   0xa   :  { %696 = vsyncadd [#allocation2], 4294967280 }
   0xb   :  { %11 = sfence }
   0xc   :  { %12 = vsyncpa [#allocation5], 0 }
   0xd   :  { %14 = vsyncpa [#allocation5 + $0x1], 0 }
   0xe   :  { %15 = vsyncpa [#allocation8], 0 }
   0xf   :  { %17 = vsyncpa [#allocation8 + $0x1], 0 }
  0x10   :  { %18 = vsyncpa [#allocation6], 0 }
  0x11   :  { %20 = vsyncpa [#allocation6 + $0x1], 0  ;;  %s774_s22 = smov 0   ;;  %s776_s23 = smov 0  }
  0x12   :  { %s778_s24 = smov 0   ;;  %s780_s25 = smov 0  }
  0x13   :  { %s782_s26 = smov 0   ;;  %s784_s0 = smov 0  }
  0x14 LB: > { %s465_s27 = sadd.s32 4294967295, %s731_s0   ;;  %s466_s28 = sadd.s32 4294967294, %s731_s0   ;;  %s731_s0 = sphi %s784_s0, %s26_s0   ;;  %s727_s26 = sphi %s782_s26, %s1129_s26   ;;  %s723_s25 = sphi %s780_s25, %s1128_s25   ;;  %s719_s24 = sphi %s778_s24, %s1127_s24   ;;  %s715_s23 = sphi %s776_s23, %s1126_s23   ;;  %s711_s22 = sphi %s774_s22, %s1125_s22  }
  0x15   : > { %s38_s29 = sadd.s32 1, %s727_s26  ;;  %s47_s30 = sadd.s32 1, %s719_s24 }
  0x16   : > { %p40_p3 = scmp.ge.s32.totalorder %s38_s29, 2  ;;  %p54_p4 = scmp.ne.s32.totalorder %s719_s24, %s715_s23 }
  0x17   : > { %p55_p5 = scmp.eq.s32.totalorder %s731_s0, 0  ;;  %p60_p6 = scmp.ne.s32.totalorder %s715_s23, %s711_s22 }
  0x18   : > { %s1131_s29 = smov (%p40_p3, %s38_s29), 0  ;;  %p61_p8 = scmp.eq.s32.totalorder %s465_s27, 0 }
  0x19   : > { %p815_p7 = por %p55_p5, %p54_p4  ;;  %s42_s5 = ssub.s32 %s727_s26, %s1131_s29 }
  0x1a   : > { %p112_p9 = scmp.eq.s32.totalorder %s465_s27, 1  ;;  %p45_p10 = scmp.eq.s32.totalorder %s42_s5, 0 }
  0x1b   : > { %p821_p11 = por %p61_p8, %p60_p6  ;;  %p118_p13 = scmp.eq.s32.totalorder %s466_s28, 1 }
  0x1c   : > { %p825_p12 = por %p112_p9, %p54_p4  ;;  %p509_p2 = scmp.lt.s32.totalorder %s731_s0, 2 }
  0x1d   : > { %s1103_s6 = scalar_select %p821_p11, 1, 0 }
  0x1e   : > { %s1104_s7 = scalar_select %p825_p12, 1, 0 }
  0x1f   : > { %s830_s8 = scalar_select %p45_p10, %s719_s24, %s47_s30  }
  0x20   : > { %p832_p0 = por %p118_p13, %p60_p6  ;;  %s839_s10 = sand.u32 1, %s719_s24  }
  0x21   : > { %s469_s11 = sshll.u32 %s839_s10, 4  ;;  %s488_s12 = sshll.u32 %s727_s26, 8 }
  0x22   : > { %s1105_s9 = scalar_select %p832_p0, 1, 0 }
  0x23   : > { %s848_s15 = scalar_lea.hbm %s1097_s1, %s488_s12  ;;  %s142_s16 = scalar_lea.vmem [#allocation4], %s469_s11 }
  0x24   : > { %s151_s17 = sshll.u32 %s142_s16, 4  ;;  %p856_p3 = pnand %p509_p2, %p815_p7  ;;  %s852_s17 = int_to_ptr.vmem [resolvable:$true] %s151_s17 }
  0x25   : > { %s139_s19 = scalar_lea.sflag [#allocation5], %s839_s10  ;;  %s583_s20 = scalar_lea.hbm %s848_s15, 256 }
  0x26   : > { %p584_p5 = scmp.ne.s32.totalorder %s848_s15, %s583_s20  ;;  %p585_p6 = pneg %p856_p3 }
  0x27   : > { %s588_s28 = scalar_lea.hbm %s1097_s1, 512  ;;  %p589_p7 = scmp.lt.u32.totalorder %s848_s15, %s1097_s1 }
  0x28   : > { %p586_p8 = pnand %p585_p6, %p584_p5  ;;  %p590_p10 = scmp.lt.u32.totalorder %s588_s28, %s583_s20 }
  0x29   : > { %p592_p2 = scmp.lt.u32.totalorder %s583_s20, %s848_s15 }
  0x2a   : > { %p587_p9 = pneg %p586_p8  ;;  %p591_p13 = por %p590_p10, %p589_p7 }
  0x2c   : > { %p593_p1 = por %p592_p2, %p591_p13 }
  0x2e   : > { %p594_p4 = pnand %p593_p1, %p587_p9 }
  0x30   : > { %597 = shalt.err (!%p594_p4)
}
  0x31   : > { %s598_s5 = scalar_lea.vmem %s852_s17, 256  ;;  %s734_s13 = smov [#allocation4]  }
  0x32   : > { %p599_p5 = scmp.ne.s32.totalorder %s852_s17, %s598_s5  ;;  %s603_s14 = sshll.u32 %s734_s13, 4  ;;  %s604_s14 = int_to_ptr.vmem [resolvable:$false] %s603_s14 }
  0x33   : > { %s605_s16 = scalar_lea.vmem %s604_s14, 512  ;;  %p606_p12 = scmp.lt.s32.totalorder %s852_s17, %s604_s14 }
  0x34   : > { %p601_p8 = pnand %p599_p5, %p585_p6  ;;  %p607_p7 = scmp.lt.s32.totalorder %s605_s16, %s598_s5 }
  0x36   : > { %p602_p0 = pneg %p601_p8  ;;  %p608_p10 = por %p607_p7, %p606_p12 }
  0x38   : > { %p609_p13 = pnand %p608_p10, %p602_p0 }
  0x3a   : > { %612 = shalt.err (!%p609_p13)
}
  0x3b   : > { %s735_s20 = smov 128   ;;  %s736_s21 = smov 8  }
  0x3c   : > { %501 = dma.hbm_to_vmem [thread:$0]  (!%p856_p3), %s848_s15, 256, %s852_s17, %s139_s19, %s735_s20, %s735_s20, %s736_s21  }
  0x3d   : > { %p182_p12 = scmp.lt.s32.totalorder %s731_s0, 3  ;;  %s898_s30 = scalar_lea.hbm %s1098_s2, %s488_s12 }
  0x3e   : > { %p1107_p0 = scmp.ge.s32.totalorder %s731_s0, 1  ;;  %s165_s5 = scalar_lea.vmem [#allocation7], %s469_s11 }
  0x3f   : > { %s174_s13 = sshll.u32 %s165_s5, 4  ;;  %s162_s15 = scalar_lea.sflag [#allocation8], %s839_s10  ;;  %s908_s13 = int_to_ptr.vmem [resolvable:$true] %s174_s13 }
  0x40   : > { %p902_p1 = pnand %p1107_p0, %p182_p12  ;;  %s613_s17 = scalar_lea.hbm %s898_s30, 256 }
  0x41   : > { %p614_p4 = scmp.ne.s32.totalorder %s898_s30, %s613_s17  ;;  %s618_s14 = scalar_lea.hbm %s1098_s2, 512 }
  0x42   : > { %p619_p5 = scmp.lt.u32.totalorder %s898_s30, %s1098_s2  ;;  %p620_p8 = scmp.lt.u32.totalorder %s618_s14, %s613_s17 }
  0x43   : > { %p616_p9 = pnand %p614_p4, %p585_p6  ;;  %p622_p10 = scmp.lt.u32.totalorder %s613_s17, %s898_s30 }
  0x44   : > { %p621_p7 = por %p620_p8, %p619_p5 }
  0x45   : > { %p617_p2 = pneg %p616_p9 }
  0x46   : > { %p623_p13 = por %p622_p10, %p621_p7 }
  0x48   : > { %p624_p12 = pnand %p623_p13, %p617_p2 }
  0x4a   : > { %627 = shalt.err (!%p624_p12)
}
  0x4b   : > { %s628_s11 = scalar_lea.vmem %s908_s13, 256  ;;  %s737_s28 = smov [#allocation7]  }
  0x4c   : > { %p629_p0 = scmp.ne.s32.totalorder %s908_s13, %s628_s11  ;;  %s633_s5 = sshll.u32 %s737_s28, 4  ;;  %s634_s5 = int_to_ptr.vmem [resolvable:$false] %s633_s5 }
  0x4d   : > { %s635_s12 = scalar_lea.vmem %s634_s5, 512  ;;  %p636_p11 = scmp.lt.s32.totalorder %s908_s13, %s634_s5 }
  0x4e   : > { %p631_p4 = pnand %p629_p0, %p585_p6  ;;  %p637_p5 = scmp.lt.s32.totalorder %s635_s12, %s628_s11 }
  0x50   : > { %p632_p9 = pneg %p631_p4  ;;  %p638_p8 = por %p637_p5, %p636_p11 }
  0x52   : > { %p639_p7 = pnand %p638_p8, %p632_p9 }
  0x54   : > { %642 = shalt.err (!%p639_p7)
}
  0x55   : > { %504 = dma.hbm_to_vmem [thread:$0]  (!%p856_p3), %s898_s30, 256, %s908_s13, %s162_s15, %s735_s20, %s735_s20, %s736_s21  }
  0x56   : > { %186 = sbr.rel (%p902_p1) target bundleno = 157 (0x9d), region = 28  ;;  %s942_s17 = sand.u32 (!%p902_p1), 1, %s715_s23  }
  0x57   : > { %s476_s19 = sshll.u32 (!%p902_p1), %s942_s17, 4  ;;  %s189_s14 = scalar_lea.sflag (!%p902_p1), [#allocation5], %s942_s17 }
  0x58   : > { %s192_s18 = scalar_lea.vmem (!%p902_p1), [#allocation4], %s476_s19  ;;  %p1109_p11 = scmp.ne.s32.totalorder (!%p902_p1), %s1103_s6, 0 }
  0x5d   : > { %698 = dma.done.wait (%p1109_p11), %s189_s14, 256  }
  0x5e   : > { %700 = vsyncadd (%p1109_p11), %s189_s14, 4294967040  ;;  %s198_s10 = scalar_lea.sflag [#allocation8], %s942_s17  ;;  %s201_s20 = scalar_lea.vmem [#allocation7], %s476_s19 }
  0x5f   : > { %702 = dma.done.wait (%p1109_p11), %s198_s10, 256  }
  0x60   : > { %704 = vsyncadd (%p1109_p11), %s198_s10, 4294967040  ;;  %s490_s21 = smul.u32 24, %s942_s17  ;;  %vm233_vm0 = vcmask 130048   ;;  %v738_v0 = vmov 0.0   ;;  %v964_v1 = vld [vmem:[%s201_s20] sm:$0xff]  ;;  %v966_v2 = vld [vmem:[%s201_s20 + $0x8] sm:$0xff]  ;;  %v238_v18 = vlaneseq }
  0x61   : > { %v968_v3 = vld [vmem:[%s192_s18] sm:$0xff]  ;;  %vm279_vm1 = vcmp.gt.f32.partialorder %v964_v1, 0.0  ;;  %vm280_vm2 = vcmp.gt.f32.partialorder %v966_v2, 0.0  ;;  %v972_v4 = vld [vmem:[%s192_s18 + $0x8] sm:$0xff]  ;;  %s478_s6 = sshll.u32 %s723_s25, 2  ;;  %s491_s5 = smul.u32 384, %s723_s25 }
  0x62   : > { %s956_s30 = scalar_lea.vmem [#allocation9], %s490_s21  ;;  %v249_v5 = vand.u32 2147483647, %v968_v3  ;;  %v480_v6 = vsel %vm279_vm1, 1.0, %v738_v0  ;;  %v481_v7 = vsel %vm280_vm2, 1.0, %v738_v0  ;;  %s284_s4 = sadd.s32 1, %s478_s6 }
  0x63   : > { %234 = vst.msk [vmem:[%s956_s30] sm:$0xff] %vm233_vm0, %v738_v0  ;;  %235 = vst.msk [vmem:[%s956_s30 + $0x8] sm:$0xff] %vm233_vm0, %v738_v0  ;;  %v250_v8 = vand.u32 2147483647, %v972_v4  ;;  %v327_v11 = vsel %vm233_vm0, %v480_v6, 0.0  ;;  %v328_v12 = vsel %vm233_vm0, %v481_v7, 0.0  ;;  %s1041_s18 = scalar_lea.hbm %s1099_s3, %s491_s5 }
  0x64   : > { %236 = vst.msk [vmem:[%s956_s30 + $0x10] sm:$0xff] %vm233_vm0, %v738_v0  ;;  %v251_v9 = vsub.f32 0.0, %v249_v5  ;;  %v329_v14 = vadd.f32 %v328_v12, %v327_v11  ;;  %s287_s13 = sadd.s32 2, %s478_s6  ;;  %s289_s15 = sadd.s32 3, %s478_s6  ;;  %v239_v23 = vshrl.u32 %v238_v18, 7  ;;  %v242_v26 = vand.u32 127, %v238_v18 }
  0x65   : > { %v252_v13 = vsub.f32 0.0, %v250_v8  ;;  %s282_s16 = sld [smem:[#allocation3 + %s478_s6]]  ;;  %v247_v44 = vmax.f32 %v968_v3, 0.0  ;;  %v248_v47 = vmax.f32 %v972_v4, 0.0  ;;  %s355_s12 = sshll.u32 %s956_s30, 4  ;;  %s1045_s12 = int_to_ptr.vmem [resolvable:$true] %s355_s12 }
  0x66   : > { %v253_v15 = vmul.f32 1.442695, %v251_v9  ;;  %s285_s27 = sld [smem:[#allocation3 + %s284_s4]]  ;;  %v240_v29 = vadd.s32 8, %v239_v23  ;;  %s342_s25 = scalar_lea.sflag [#allocation6], %s942_s17 }
  0x67   : > { %v255_v16 = vmul.f32 1.442695, %v252_v13  ;;  %s288_s11 = sld [smem:[#allocation3 + %s287_s13]]  ;;  %s643_s10 = scalar_lea.vmem %s1045_s12, 384 }
  0x68   : > { %565 = vpow2.f32 %v253_v15  ;;  %s290_s28 = sld [smem:[#allocation3 + %s289_s15]]  ;;  %p644_p3 = scmp.ne.s32.totalorder %s1045_s12, %s643_s10 }
  0x69   : > { %567 = vpow2.f32 %v255_v16  ;;  %p1122_p6 = scmp.ne.s32.totalorder %s1104_s7, 0  ;;  %s739_s20 = smov [#allocation9]  }
  0x6a   : > { %v479_v10 = vld [vmem:[%s956_s30 + $0x8] sm:$0xff]  ;;  %s647_s21 = sshll.u32 %s739_s20, 4  ;;  %s648_s21 = int_to_ptr.vmem [resolvable:$false] %s647_s21 }
  0x6b   : > { %v330_v17 = vadd.f32 %v479_v10, %v329_v14  ;;  %v291_v27 = vstv %s282_s16  ;;  %v483_v60 = vld [vmem:[%s956_s30 + $0x10] sm:$0xff]  ;;  %p645_p1 = pnand %p644_p3, %p1122_p6  ;;  %s649_s6 = scalar_lea.vmem %s648_s21, 768 }
  0x6c   : > { %v294_v28 = vstv %s285_s27  ;;  %vm986_vm3 = vcmp.ge.s32.totalorder %v239_v23, %v291_v27  ;;  %vm1002_vm7 = vcmp.ge.s32.totalorder %v240_v29, %v291_v27  ;;  %p650_p10 = scmp.lt.s32.totalorder %s1045_s12, %s648_s21  ;;  %p651_p13 = scmp.lt.s32.totalorder %s649_s6, %s643_s10 }
  0x6d   : > { %482 = vst.msk [vmem:[%s956_s30 + $0x8] sm:$0xff] %vm233_vm0, %v330_v17  ;;  %v299_v30 = vstv %s288_s11  ;;  %vm990_vm4 = vcmp.lt.s32.totalorder %v239_v23, %v294_v28  ;;  %vm1006_vm8 = vcmp.lt.s32.totalorder %v240_v29, %v294_v28  ;;  %p646_p2 = pneg %p645_p1 }
  0x6e   : > { %v301_v31 = vstv %s290_s28  ;;  %vm994_vm5 = vcmp.ge.s32.totalorder %v242_v26, %v299_v30  ;;  %vm297_vm9 = vmand %vm986_vm3, %vm990_vm4  ;;  %p652_p12 = por %p651_p13, %p650_p10 }
  0x6f   : > { %vm998_vm6 = vcmp.lt.s32.totalorder %v242_v26, %v301_v31  ;;  %vm298_vm13 = vmand %vm1002_vm7, %vm1006_vm8 }
  0x70   : > { %vm303_vm11 = vmand %vm994_vm5, %vm998_vm6  ;;  %p653_p0 = pnand %p652_p12, %p646_p2 }
  0x71   : > { %vm310_vm14 = vmand %vm297_vm9, %vm303_vm11 }
  0x72   : > { %v566_v19 = vpop.eup %565  ;;  %vm311_vm15 = vmand %vm298_vm13, %vm303_vm11 }
  0x73   : > { %v568_v20 = vpop.eup %567  ;;  %v257_v21 = vadd.f32 1.0, %v566_v19  ;;  %v260_v24 = vmul.f32 -0.5, %v566_v19  ;;  %v263_v33 = vand.u32 2147483647, %v566_v19 }
  0x74   : > { %v266_v22 = vadd.f32 1.0, %v568_v20  ;;  %v269_v25 = vmul.f32 -0.5, %v568_v20  ;;  %v272_v37 = vand.u32 2147483647, %v568_v20 }
  0x75   : > { %569 = vlog2.f32 %v257_v21  ;;  %v261_v32 = vadd.f32 1.0, %v260_v24  ;;  %vm264_vm10 = vcmp.lt.f32.partialorder %v263_v33, 0.0004427343 }
  0x76   : > { %571 = vlog2.f32 %v266_v22  ;;  %v270_v34 = vadd.f32 1.0, %v269_v25  ;;  %vm273_vm12 = vcmp.lt.f32.partialorder %v272_v37, 0.0004427343 }
  0x77   : > { %v262_v42 = vmul.f32 %v566_v19, %v261_v32 }
  0x78   : > { %v271_v45 = vmul.f32 %v568_v20, %v270_v34 }
  0x7f   : > { %v570_v43 = vpop.eup %569 }
  0x80   : > { %v572_v46 = vpop.eup %571  ;;  %v259_v48 = vmul.f32 0.6931472, %v570_v43 }
  0x81   : > { %v268_v49 = vmul.f32 0.6931472, %v572_v46 }
  0x82   : > { %v265_v50 = vsel %vm264_vm10, %v262_v42, %v259_v48 }
  0x83   : > { %v274_v51 = vsel %vm273_vm12, %v271_v45, %v268_v49  ;;  %v275_v52 = vadd.f32 %v265_v50, %v247_v44 }
  0x84   : > { %v276_v53 = vadd.f32 %v274_v51, %v248_v47 }
  0x85   : > { %v277_v54 = vsub.f32 %v275_v52, %v968_v3  ;;  %v334_v55 = vsel %vm310_vm14, 0.0, %v275_v52  ;;  %v312_v3 = vld [vmem:[%s956_s30] sm:$0xff] }
  0x86   : > { %v278_v56 = vsub.f32 %v276_v53, %v972_v4  ;;  %v335_v57 = vsel %vm311_vm15, 0.0, %v276_v53  ;;  %v336_v58 = vsel %vm233_vm0, %v334_v55, 0.0 }
  0x87   : > { %v313_v59 = vsel %vm279_vm1, %v277_v54, 0.0  ;;  %v337_v61 = vsel %vm233_vm0, %v335_v57, 0.0 }
  0x88   : > { %v314_v62 = vsel %vm280_vm2, %v278_v56, 0.0  ;;  %v316_v63 = vsel %vm233_vm0, %v313_v59, 0.0  ;;  %v338_v0 = vadd.f32 %v337_v61, %v336_v58 }
  0x89   : > { %v317_v4 = vsel %vm233_vm0, %v314_v62, 0.0 }
  0x8a   : > { %v318_v5 = vadd.f32 %v317_v4, %v316_v63  ;;  %v339_v1 = vadd.f32 %v483_v60, %v338_v0 }
  0x8c   : > { %v319_v6 = vadd.f32 %v318_v5, %v312_v3  ;;  %484 = vst.msk [vmem:[%s956_s30 + $0x10] sm:$0xff] %vm233_vm0, %v339_v1 }
  0x8e   : > { %320 = vst.msk [vmem:[%s956_s30] sm:$0xff] %vm233_vm0, %v319_v6 }
  0x8f   : > { %656 = shalt.err (!%p653_p0)
}
  0x90   : > { %s657_s30 = scalar_lea.hbm %s1041_s18, 384  ;;  %s661_s15 = scalar_lea.hbm %s1099_s3, 768 }
  0x91   : > { %p658_p4 = scmp.ne.s32.totalorder %s1041_s18, %s657_s30  ;;  %p662_p8 = scmp.lt.u32.totalorder %s1041_s18, %s1099_s3 }
  0x92   : > { %p663_p7 = scmp.lt.u32.totalorder %s661_s15, %s657_s30  ;;  %p665_p3 = scmp.lt.u32.totalorder %s657_s30, %s1041_s18 }
  0x93   : > { %p659_p9 = pnand %p658_p4, %p1122_p6 }
  0x94   : > { %p664_p11 = por %p663_p7, %p662_p8 }
  0x95   : > { %p660_p5 = pneg %p659_p9 }
  0x96   : > { %p666_p1 = por %p665_p3, %p664_p11 }
  0x98   : > { %p667_p2 = pnand %p666_p1, %p660_p5 }
  0x9a   : > { %670 = shalt.err (!%p667_p2)
}
  0x9b   : > { %s740_s11 = smov 128   ;;  %s741_s28 = smov 8  }
  0x9c   : > { %496 = dma.vmem_to_hbm [thread:$0]  (%p1122_p6), %s1045_s12, 384, %s1041_s18, %s342_s25, %s740_s11, %s740_s11, %s741_s28  }
  0x9d PF: > { %s370_s5 = sand.u32 1, %s711_s22   ;;  %p1123_p10 = scmp.ne.s32.totalorder %s1105_s9, 0 }
  0x9e   : > { %p1124_p13 = scmp.ge.s32.totalorder %s731_s0, 2  ;;  %s371_s19 = scalar_lea.sflag [#allocation6], %s370_s5 }
  0xa0   : > { %p506_p12 = pnand %p1124_p13, %p1123_p10 }
  0xa2   : > { %706 = dma.done.wait (!%p506_p12), %s371_s19, 384  }
  0xa3   : > { %708 = vsyncadd (!%p506_p12), %s371_s19, 4294966912  ;;  %s26_s0 = sadd.s32 1, %s731_s0   ;;  %s1125_s22 = smov %s715_s23 }
  0xa4   : > { %p23_p0 = scmp.ge.s32.totalorder %s26_s0, 4   ;;  %s1126_s23 = smov %s719_s24 }
  0xa5   : > { %s1127_s24 = smov %s830_s8  ;;  %s1128_s25 = smov %s727_s26 }
  0xa6   : > { %s1129_s26 = smov %s1131_s29  ;;  %25 = sbr.rel (!%p23_p0) target bundleno = 20 (0x14), region = 92 }
  0xad   :  { %376 = vsyncpa [#allocation5], 1 }
  0xae   :  { %378 = vsyncpa [#allocation5 + $0x1], 1 }
  0xaf   :  { %379 = vsyncpa [#allocation8], 1 }
  0xb0   :  { %381 = vsyncpa [#allocation8 + $0x1], 1 }
  0xb1   :  { %382 = vsyncpa [#allocation6], 1 }
  0xb2   :  { %384 = vsyncpa [#allocation6 + $0x1], 1 }

</bundles_post_ra>
